<compile_context>
chip_gen: v5e
topology: v5e:2x2
jax: 0.10.0
libtpu: 0.0.40
codegen_flags: <defaults>
</compile_context>

<pallas_src>
import functools

import numpy as np
import jax
import jax.numpy as jnp
from jax import lax
from jax.experimental import pallas as pl
from jax.experimental.pallas import tpu as pltpu


MATMUL_BF16 = True                     # bf16 activations/weights on the MXU, f32 accumulate
VMEM_LIMIT_BYTES = 48 * 1024 * 1024    # >= v5e/v6e scoped defaults, < v7x 64 MiB physical


def _round_up(x, m):
    return (x + m - 1) // m * m


# --------------------------------------------------------------------------------------
# Fused  y = act(x @ w + b)  kernel, tiled over rows (conv-as-matmul).
# --------------------------------------------------------------------------------------
def _matmul_bias_act_kernel(x_ref, w_ref, b_ref, o_ref, *, act):
    y = jnp.dot(x_ref[...], w_ref[...], preferred_element_type=jnp.float32)
    y = y + b_ref[...]                 # bias + ReLU epilogue kept in f32 (v5e has no bf16 VPU)
    if act == "relu":
        y = jnp.maximum(y, 0.0)
    o_ref[...] = y.astype(o_ref.dtype)


def matmul_bias_act(x, w, b, *, act="none", out_dtype=jnp.float32, tile_n=512):
    """x: (R, K), w: (K, C), b: (C,) -> act(x @ w + b) as (R, C) in out_dtype."""
    R, K = x.shape
    Kw, C = w.shape
    assert K == Kw
    w = w.astype(x.dtype)                       # matmul operands share the activation dtype
    b = b.reshape(1, C).astype(jnp.float32)

    # Large 8-aligned row tiles; force >= 2 grid steps so the "parallel" row grid can be
    # sharded across both TensorCores on v7x (near-free extra step on v5e/v6e).
    Rp8 = _round_up(R, 8)
    tile = min(tile_n, Rp8)
    if tile == Rp8 and Rp8 >= 16:
        tile = _round_up((Rp8 + 1) // 2, 8)
    Rp = _round_up(Rp8, tile)
    if Rp != R:
        x = jnp.pad(x, ((0, Rp - R), (0, 0)))
    grid = (Rp // tile,)

    in_b = jnp.dtype(x.dtype).itemsize
    out_b = jnp.dtype(out_dtype).itemsize
    cost = pl.CostEstimate(
        flops=2 * Rp * K * C, transcendentals=0,
        bytes_accessed=in_b * (Rp * K + K * C) + 4 * C + out_b * Rp * C)

    out = pl.pallas_call(
        functools.partial(_matmul_bias_act_kernel, act=act),
        out_shape=jax.ShapeDtypeStruct((Rp, C), out_dtype),
        grid_spec=pltpu.PrefetchScalarGridSpec(
            num_scalar_prefetch=0,
            grid=grid,
            in_specs=[
                pl.BlockSpec((tile, K), lambda i: (i, 0)),   # activations: row-tiled
                pl.BlockSpec((K, C), lambda i: (0, 0)),      # weights: resident
                pl.BlockSpec((1, C), lambda i: (0, 0)),      # bias: resident
            ],
            out_specs=pl.BlockSpec((tile, C), lambda i: (i, 0)),
        ),
        compiler_params=pltpu.CompilerParams(
            dimension_semantics=("parallel",),
            vmem_limit_bytes=VMEM_LIMIT_BYTES,
        ),
        cost_estimate=cost,
    )(x, w, b)
    return out[:R]


# --------------------------------------------------------------------------------------
# Conv2d(3x3, stride 2, pad 1) + BatchNorm2d(eval) + ReLU as one fused Pallas matmul.
# im2col / BN folding are wrapper-side layout plumbing; all FLOPs run on the MXU.
# --------------------------------------------------------------------------------------
def conv_bn_relu(x_nhwc, w_oihw, b, gamma, beta, mean, var, *, eps=1e-5,
                 act_dtype=jnp.float32, tile_n=512):
    N, H, W, Cin = x_nhwc.shape
    Cout = w_oihw.shape[0]
    Ho = (H - 1) // 2 + 1
    Wo = (W - 1) // 2 + 1

    # im2col in the activation dtype (bf16 halves the ~2.25x patch-tensor HBM traffic).
    xp = jnp.pad(x_nhwc.astype(act_dtype), ((0, 0), (1, 1), (1, 1), (0, 0)))
    cols = []
    for dy in range(3):
        for dx in range(3):
            cols.append(xp[:, dy: dy + 2 * (Ho - 1) + 1: 2,
                            dx: dx + 2 * (Wo - 1) + 1: 2, :])
    patches = jnp.concatenate(cols, axis=-1).reshape(N * Ho * Wo, 9 * Cin)

    # Fold conv bias + eval-mode BN into the matmul weight / bias.
    scale = gamma / jnp.sqrt(var + eps)
    w_mat = jnp.transpose(w_oihw, (2, 3, 1, 0)).reshape(9 * Cin, Cout) * scale[None, :]
    bias = (b - mean) * scale + beta

    y = matmul_bias_act(patches, w_mat, bias, act="relu",
                        out_dtype=act_dtype, tile_n=tile_n)
    return y.reshape(N, Ho, Wo, Cout)


# --------------------------------------------------------------------------------------
# Fully fused GRU: grid=(1,), whole sequence resident in VMEM, in-kernel fori_loop.
# Packed gate weights: W_ih (F, 3H), W_hh (H, 3H); PyTorch gate order (r, z, n);
# h_t = (1 - z) * n + z * h_{t-1}.  Hidden state is a loop carry (no scratch buffer).
# --------------------------------------------------------------------------------------
def _gru_kernel(feat_ref, wih_ref, bih_ref, whh_ref, bhh_ref, h_ref):
    T = feat_ref.shape[0]
    H = whh_ref.shape[0]
    wih = wih_ref[...]          # (F, 3H)  activation dtype (bf16/f32)
    whh = whh_ref[...]          # (H, 3H)  f32 recurrence
    bih = bih_ref[...]          # (1, 3H)  f32
    bhh = bhh_ref[...]          # (1, 3H)  f32

    def step(t, h):
        x_t = feat_ref[t]                                                  # (N, F)
        gi = jnp.dot(x_t, wih, preferred_element_type=jnp.float32) + bih   # (N, 3H)
        gh = jnp.dot(h, whh, preferred_element_type=jnp.float32) + bhh     # (N, 3H)
        r = jax.nn.sigmoid(gi[:, :H] + gh[:, :H])
        z = jax.nn.sigmoid(gi[:, H:2 * H] + gh[:, H:2 * H])
        n = jnp.tanh(gi[:, 2 * H:] + r * gh[:, 2 * H:])
        return (1.0 - z) * n + z * h

    h0 = jnp.zeros(h_ref.shape, jnp.float32)
    h_ref[...] = lax.fori_loop(0, T, step, h0, unroll=T <= 16)


def gru_final_hidden(feat_tnf, w_ih, b_ih, w_hh, b_hh, hidden):
    """feat_tnf: (T, N, F); PyTorch-layout GRU weights.  Returns final hidden (N, H) f32."""
    T, N, F = feat_tnf.shape
    H = hidden
    wih = jnp.transpose(w_ih).astype(feat_tnf.dtype)     # (F, 3H) packed gates
    whh = jnp.transpose(w_hh).astype(jnp.float32)        # (H, 3H) packed gates
    bih = b_ih.reshape(1, 3 * H).astype(jnp.float32)
    bhh = b_hh.reshape(1, 3 * H).astype(jnp.float32)

    fb = jnp.dtype(feat_tnf.dtype).itemsize
    cost = pl.CostEstimate(
        flops=2 * T * N * (F + H) * 3 * H,
        transcendentals=3 * T * N * H,
        bytes_accessed=fb * (T * N * F + F * 3 * H) + 4 * (H * 3 * H + 6 * H + N * H))

    return pl.pallas_call(
        _gru_kernel,
        out_shape=jax.ShapeDtypeStruct((N, H), jnp.float32),
        grid_spec=pltpu.PrefetchScalarGridSpec(
            num_scalar_prefetch=0,
            grid=(1,),
            in_specs=[
                pl.BlockSpec((T, N, F), lambda i: (0, 0, 0)),
                pl.BlockSpec((F, 3 * H), lambda i: (0, 0)),
                pl.BlockSpec((1, 3 * H), lambda i: (0, 0)),
                pl.BlockSpec((H, 3 * H), lambda i: (0, 0)),
                pl.BlockSpec((1, 3 * H), lambda i: (0, 0)),
            ],
            out_specs=pl.BlockSpec((N, H), lambda i: (0, 0)),
        ),
        compiler_params=pltpu.CompilerParams(
            dimension_semantics=("arbitrary",),          # sequential recurrence
            vmem_limit_bytes=VMEM_LIMIT_BYTES,
        ),
        cost_estimate=cost,
    )(feat_tnf, wih, bih, whh, bhh)


# --------------------------------------------------------------------------------------
# Full ReferenceEncoder forward.
# --------------------------------------------------------------------------------------
def reference_encoder(inputs, params, *, n_mel_channels, gru_size, tile_n=512):
    """inputs: (N, Ty/r, n_mels*r) -> (N, gru_size)."""
    N = inputs.shape[0]
    act_dtype = jnp.bfloat16 if MATMUL_BF16 else jnp.float32
    # torch: inputs.view(N, 1, -1, n_mel_channels) (NCHW, C=1) -> NHWC here.
    x = inputs.reshape(N, -1, n_mel_channels)[..., None]          # (N, T, n_mels, 1)

    for layer in params["convs"]:
        x = conv_bn_relu(x, layer["w"], layer["b"], layer["gamma"], layer["beta"],
                         layer["mean"], layer["var"], act_dtype=act_dtype, tile_n=tile_n)

    # torch: out.transpose(1, 2).contiguous().view(N, T, -1) (channel-major, freq-minor);
    # presented time-major (T, N, C*F) for the fused GRU kernel.
    Nn, Tt, Ff, Cc = x.shape
    feat = jnp.transpose(x, (1, 0, 3, 2)).reshape(Tt, Nn, Cc * Ff)

    g = params["gru"]
    h = gru_final_hidden(feat, g["w_ih"], g["b_ih"], g["w_hh"], g["b_hh"], gru_size)
    return h                                                      # == out.squeeze(0)


# --------------------------------------------------------------------------------------
# Parameter init (matches module shapes; BN uses running statistics).
# --------------------------------------------------------------------------------------
def calculate_channels(L, kernel_size, stride, pad, n_convs):
    for _ in range(n_convs):
        L = (L - kernel_size + 2 * pad) // stride + 1
    return L


def init_params(key, n_mel_channels, ref_enc_filters, gru_size):
    params = {"convs": [], "gru": {}}
    filters = [1] + list(ref_enc_filters)
    for i in range(len(ref_enc_filters)):
        cin, cout = filters[i], filters[i + 1]
        key, kw, kb, kg, kbe, km, kv = jax.random.split(key, 7)
        limit = float(np.sqrt(1.0 / (cin * 9)))
        params["convs"].append(dict(
            w=jax.random.uniform(kw, (cout, cin, 3, 3), jnp.float32, -limit, limit),
            b=jax.random.uniform(kb, (cout,), jnp.float32, -limit, limit),
            gamma=jax.random.uniform(kg, (cout,), jnp.float32, 0.5, 1.5),
            beta=0.1 * jax.random.normal(kbe, (cout,), jnp.float32),
            mean=0.1 * jax.random.normal(km, (cout,), jnp.float32),
            var=jax.random.uniform(kv, (cout,), jnp.float32, 0.5, 1.5)))
    out_channels = calculate_channels(n_mel_channels, 3, 2, 1, len(ref_enc_filters))
    in_size = ref_enc_filters[-1] * out_channels
    k = float(1.0 / np.sqrt(gru_size))
    key, k1, k2, k3, k4 = jax.random.split(key, 5)
    params["gru"] = dict(
        w_ih=jax.random.uniform(k1, (3 * gru_size, in_size), jnp.float32, -k, k),
        w_hh=jax.random.uniform(k2, (3 * gru_size, gru_size), jnp.float32, -k, k),
        b_ih=jax.random.uniform(k3, (3 * gru_size,), jnp.float32, -k, k),
        b_hh=jax.random.uniform(k4, (3 * gru_size,), jnp.float32, -k, k))
    return params


# --------------------------------------------------------------------------------------
# Pure-JAX (XLA) reference of the same forward pass, for correctness checking.
# Uses lax.conv_general_dilated (independent of the im2col path) with matching casts.
# --------------------------------------------------------------------------------------
def _reference(inputs, params, *, n_mel_channels, gru_size):
    act_dtype = jnp.bfloat16 if MATMUL_BF16 else jnp.float32
    N = inputs.shape[0]
    x = inputs.reshape(N, -1, n_mel_channels)[:, None, :, :]      # NCHW
    for layer in params["convs"]:
        scale = layer["gamma"] / jnp.sqrt(layer["var"] + 1e-5)
        w = (layer["w"] * scale[:, None, None, None]).astype(act_dtype)
        bias = (layer["b"] - layer["mean"]) * scale + layer["beta"]
        x = lax.conv_general_dilated(
            x.astype(act_dtype), w, window_strides=(2, 2), padding=((1, 1), (1, 1)),
            dimension_numbers=("NCHW", "OIHW", "NCHW"),
            preferred_element_type=jnp.float32)
        x = jax.nn.relu(x + bias[None, :, None, None]).astype(act_dtype)
    Nn, Cc, Tt, Ff = x.shape
    feat = jnp.transpose(x, (0, 2, 1, 3)).reshape(Nn, Tt, Cc * Ff)

    g = params["gru"]
    H = gru_size
    w_ih = g["w_ih"].astype(feat.dtype)

    def step(h, x_t):
        gi = jnp.dot(x_t, w_ih.T, preferred_element_type=jnp.float32) + g["b_ih"]
        gh = jnp.dot(h, g["w_hh"].T, preferred_element_type=jnp.float32) + g["b_hh"]
        r = jax.nn.sigmoid(gi[:, :H] + gh[:, :H])
        z = jax.nn.sigmoid(gi[:, H:2 * H] + gh[:, H:2 * H])
        n = jnp.tanh(gi[:, 2 * H:] + r * gh[:, 2 * H:])
        return (1.0 - z) * n + z * h, None

    h0 = jnp.zeros((N, H), jnp.float32)
    h_final, _ = lax.scan(step, h0, jnp.transpose(feat, (1, 0, 2)))
    return h_final


if __name__ == "__main__":
    key = jax.random.PRNGKey(0)

    # Small hp-like config:  ref_enc_filters=[8,8,16], n_mel_channels=16, gru_size=32
    batch, n_frames, n_mel_channels = 2, 32, 16
    ref_enc_filters = [8, 8, 16]
    gru_size = 32

    key, ki, kp = jax.random.split(key, 3)
    inputs = jax.random.normal(ki, (batch, n_frames, n_mel_channels), jnp.float32)
    params = init_params(kp, n_mel_channels, ref_enc_filters, gru_size)

    fwd = jax.jit(functools.partial(reference_encoder,
                                    n_mel_channels=n_mel_channels, gru_size=gru_size))
    out = jax.block_until_ready(fwd(inputs, params))
    assert out.shape == (batch, gru_size)

    ref = _reference(inputs, params,
                     n_mel_channels=n_mel_channels, gru_size=gru_size)
    np.testing.assert_allclose(np.asarray(out), np.asarray(ref), rtol=2e-2, atol=2e-2)

    print("KERNEL_OK")
</pallas_src>

<mosaic_0001>
module attributes {stable_mosaic.version = 11 : i64} {
  func.func @_matmul_bias_act_kernel(%arg0: i32, %arg1: memref<128x9xbf16, #tpu.memory_space<vmem>>, %arg2: memref<9x8xbf16, #tpu.memory_space<vmem>>, %arg3: memref<1x8xf32, #tpu.memory_space<vmem>>, %arg4: memref<128x8xbf16, #tpu.memory_space<vmem>>) attributes {dimension_semantics = [#tpu.dimension_semantics<parallel>], iteration_bounds = array<i64: 2>, scalar_prefetch = 0 : i64, scratch_operands = 0 : i64, tpu.core_type = #tpu.core_type<tc>, window_params = [{transform_indices = @transform_0, window_bounds = array<i64: 128, 9>}, {pipeline_mode = #tpu.pipeline_mode<synchronous>, transform_indices = @transform_1, window_bounds = array<i64: 9, 8>}, {pipeline_mode = #tpu.pipeline_mode<synchronous>, transform_indices = @transform_2, window_bounds = array<i64: 1, 8>}, {transform_indices = @transform_3, window_bounds = array<i64: 128, 8>}]} {
    %c0 = arith.constant 0 : index
    %c0_0 = arith.constant 0 : index
    %0 = vector.load %arg1[%c0, %c0_0] : memref<128x9xbf16, #tpu.memory_space<vmem>>, vector<128x9xbf16>
    %c0_1 = arith.constant 0 : index
    %c0_2 = arith.constant 0 : index
    %1 = vector.load %arg2[%c0_1, %c0_2] : memref<9x8xbf16, #tpu.memory_space<vmem>>, vector<9x8xbf16>
    %cst = arith.constant dense<0.000000e+00> : vector<128x8xf32>
    %2 = tpu.matmul %0, %1, %cst {dimension_numbers = #tpu.dot_dimension_numbers<[1], [0], [0], [1], [0, 0, 1, 1], [], []>} : vector<128x9xbf16>, vector<9x8xbf16>, vector<128x8xf32> -> vector<128x8xf32>
    %c0_3 = arith.constant 0 : index
    %c0_4 = arith.constant 0 : index
    %3 = vector.load %arg3[%c0_3, %c0_4] : memref<1x8xf32, #tpu.memory_space<vmem>>, vector<1x8xf32>
    %4 = vector.broadcast %3 : vector<1x8xf32> to vector<128x8xf32>
    %5 = arith.addf %2, %4 : vector<128x8xf32>
    %cst_5 = arith.constant 0.000000e+00 : f32
    %6 = vector.broadcast %cst_5 : f32 to vector<128x8xf32>
    %7 = arith.maximumf %5, %6 : vector<128x8xf32>
    %8 = arith.truncf %7 : vector<128x8xf32> to vector<128x8xbf16>
    %c0_6 = arith.constant 0 : index
    %c0_7 = arith.constant 0 : index
    %9 = vector.load %arg4[%c0_6, %c0_7] : memref<128x8xbf16, #tpu.memory_space<vmem>>, vector<128x8xbf16>
    tpu.vector_store %arg4[%c0_6, %c0_7], %8 {strides = array<i32>} : memref<128x8xbf16, #tpu.memory_space<vmem>>, vector<128x8xbf16>,
    return
  }
  func.func @transform_0(%arg0: i32) -> (i32, i32) {
    %c0_i32 = arith.constant 0 : i32
    %c0_i32_0 = arith.constant 0 : i32
    return %arg0, %c0_i32 : i32, i32
  }
  func.func @transform_1(%arg0: i32) -> (i32, i32) {
    %c0_i32 = arith.constant 0 : i32
    %c0_i32_0 = arith.constant 0 : i32
    %c0_i32_1 = arith.constant 0 : i32
    return %c0_i32, %c0_i32_0 : i32, i32
  }
  func.func @transform_2(%arg0: i32) -> (i32, i32) {
    %c0_i32 = arith.constant 0 : i32
    %c0_i32_0 = arith.constant 0 : i32
    %c0_i32_1 = arith.constant 0 : i32
    return %c0_i32, %c0_i32_0 : i32, i32
  }
  func.func @transform_3(%arg0: i32) -> (i32, i32) {
    %c0_i32 = arith.constant 0 : i32
    %c0_i32_0 = arith.constant 0 : i32
    return %arg0, %c0_i32 : i32, i32
  }
}

module attributes {stable_mosaic.version = 11 : i64} {
  func.func @_matmul_bias_act_kernel(%arg0: i32, %arg1: memref<32x72xbf16, #tpu.memory_space<vmem>>, %arg2: memref<72x8xbf16, #tpu.memory_space<vmem>>, %arg3: memref<1x8xf32, #tpu.memory_space<vmem>>, %arg4: memref<32x8xbf16, #tpu.memory_space<vmem>>) attributes {dimension_semantics = [#tpu.dimension_semantics<parallel>], iteration_bounds = array<i64: 2>, scalar_prefetch = 0 : i64, scratch_operands = 0 : i64, tpu.core_type = #tpu.core_type<tc>, window_params = [{transform_indices = @transform_0, window_bounds = array<i64: 32, 72>}, {pipeline_mode = #tpu.pipeline_mode<synchronous>, transform_indices = @transform_1, window_bounds = array<i64: 72, 8>}, {pipeline_mode = #tpu.pipeline_mode<synchronous>, transform_indices = @transform_2, window_bounds = array<i64: 1, 8>}, {transform_indices = @transform_3, window_bounds = array<i64: 32, 8>}]} {
    %c0 = arith.constant 0 : index
    %c0_0 = arith.constant 0 : index
    %0 = vector.load %arg1[%c0, %c0_0] : memref<32x72xbf16, #tpu.memory_space<vmem>>, vector<32x72xbf16>
    %c0_1 = arith.constant 0 : index
    %c0_2 = arith.constant 0 : index
    %1 = vector.load %arg2[%c0_1, %c0_2] : memref<72x8xbf16, #tpu.memory_space<vmem>>, vector<72x8xbf16>
    %cst = arith.constant dense<0.000000e+00> : vector<32x8xf32>
    %2 = tpu.matmul %0, %1, %cst {dimension_numbers = #tpu.dot_dimension_numbers<[1], [0], [0], [1], [0, 0, 1, 1], [], []>} : vector<32x72xbf16>, vector<72x8xbf16>, vector<32x8xf32> -> vector<32x8xf32>
    %c0_3 = arith.constant 0 : index
    %c0_4 = arith.constant 0 : index
    %3 = vector.load %arg3[%c0_3, %c0_4] : memref<1x8xf32, #tpu.memory_space<vmem>>, vector<1x8xf32>
    %4 = vector.broadcast %3 : vector<1x8xf32> to vector<32x8xf32>
    %5 = arith.addf %2, %4 : vector<32x8xf32>
    %cst_5 = arith.constant 0.000000e+00 : f32
    %6 = vector.broadcast %cst_5 : f32 to vector<32x8xf32>
    %7 = arith.maximumf %5, %6 : vector<32x8xf32>
    %8 = arith.truncf %7 : vector<32x8xf32> to vector<32x8xbf16>
    %c0_6 = arith.constant 0 : index
    %c0_7 = arith.constant 0 : index
    %9 = vector.load %arg4[%c0_6, %c0_7] : memref<32x8xbf16, #tpu.memory_space<vmem>>, vector<32x8xbf16>
    tpu.vector_store %arg4[%c0_6, %c0_7], %8 {strides = array<i32>} : memref<32x8xbf16, #tpu.memory_space<vmem>>, vector<32x8xbf16>,
    return
  }
  func.func @transform_0(%arg0: i32) -> (i32, i32) {
    %c0_i32 = arith.constant 0 : i32
    %c0_i32_0 = arith.constant 0 : i32
    return %arg0, %c0_i32 : i32, i32
  }
  func.func @transform_1(%arg0: i32) -> (i32, i32) {
    %c0_i32 = arith.constant 0 : i32
    %c0_i32_0 = arith.constant 0 : i32
    %c0_i32_1 = arith.constant 0 : i32
    return %c0_i32, %c0_i32_0 : i32, i32
  }
  func.func @transform_2(%arg0: i32) -> (i32, i32) {
    %c0_i32 = arith.constant 0 : i32
    %c0_i32_0 = arith.constant 0 : i32
    %c0_i32_1 = arith.constant 0 : i32
    return %c0_i32, %c0_i32_0 : i32, i32
  }
  func.func @transform_3(%arg0: i32) -> (i32, i32) {
    %c0_i32 = arith.constant 0 : i32
    %c0_i32_0 = arith.constant 0 : i32
    return %arg0, %c0_i32 : i32, i32
  }
}

module attributes {stable_mosaic.version = 11 : i64} {
  func.func @_matmul_bias_act_kernel(%arg0: i32, %arg1: memref<8x72xbf16, #tpu.memory_space<vmem>>, %arg2: memref<72x16xbf16, #tpu.memory_space<vmem>>, %arg3: memref<1x16xf32, #tpu.memory_space<vmem>>, %arg4: memref<8x16xbf16, #tpu.memory_space<vmem>>) attributes {dimension_semantics = [#tpu.dimension_semantics<parallel>], iteration_bounds = array<i64: 2>, scalar_prefetch = 0 : i64, scratch_operands = 0 : i64, tpu.core_type = #tpu.core_type<tc>, window_params = [{transform_indices = @transform_0, window_bounds = array<i64: 8, 72>}, {pipeline_mode = #tpu.pipeline_mode<synchronous>, transform_indices = @transform_1, window_bounds = array<i64: 72, 16>}, {pipeline_mode = #tpu.pipeline_mode<synchronous>, transform_indices = @transform_2, window_bounds = array<i64: 1, 16>}, {transform_indices = @transform_3, window_bounds = array<i64: 8, 16>}]} {
    %c0 = arith.constant 0 : index
    %c0_0 = arith.constant 0 : index
    %0 = vector.load %arg1[%c0, %c0_0] : memref<8x72xbf16, #tpu.memory_space<vmem>>, vector<8x72xbf16>
    %c0_1 = arith.constant 0 : index
    %c0_2 = arith.constant 0 : index
    %1 = vector.load %arg2[%c0_1, %c0_2] : memref<72x16xbf16, #tpu.memory_space<vmem>>, vector<72x16xbf16>
    %cst = arith.constant dense<0.000000e+00> : vector<8x16xf32>
    %2 = tpu.matmul %0, %1, %cst {dimension_numbers = #tpu.dot_dimension_numbers<[1], [0], [0], [1], [0, 0, 1, 1], [], []>} : vector<8x72xbf16>, vector<72x16xbf16>, vector<8x16xf32> -> vector<8x16xf32>
    %c0_3 = arith.constant 0 : index
    %c0_4 = arith.constant 0 : index
    %3 = vector.load %arg3[%c0_3, %c0_4] : memref<1x16xf32, #tpu.memory_space<vmem>>, vector<1x16xf32>
    %4 = vector.broadcast %3 : vector<1x16xf32> to vector<8x16xf32>
    %5 = arith.addf %2, %4 : vector<8x16xf32>
    %cst_5 = arith.constant 0.000000e+00 : f32
    %6 = vector.broadcast %cst_5 : f32 to vector<8x16xf32>
    %7 = arith.maximumf %5, %6 : vector<8x16xf32>
    %8 = arith.truncf %7 : vector<8x16xf32> to vector<8x16xbf16>
    %c0_6 = arith.constant 0 : index
    %c0_7 = arith.constant 0 : index
    %9 = vector.load %arg4[%c0_6, %c0_7] : memref<8x16xbf16, #tpu.memory_space<vmem>>, vector<8x16xbf16>
    tpu.vector_store %arg4[%c0_6, %c0_7], %8 {strides = array<i32>} : memref<8x16xbf16, #tpu.memory_space<vmem>>, vector<8x16xbf16>,
    return
  }
  func.func @transform_0(%arg0: i32) -> (i32, i32) {
    %c0_i32 = arith.constant 0 : i32
    %c0_i32_0 = arith.constant 0 : i32
    return %arg0, %c0_i32 : i32, i32
  }
  func.func @transform_1(%arg0: i32) -> (i32, i32) {
    %c0_i32 = arith.constant 0 : i32
    %c0_i32_0 = arith.constant 0 : i32
    %c0_i32_1 = arith.constant 0 : i32
    return %c0_i32, %c0_i32_0 : i32, i32
  }
  func.func @transform_2(%arg0: i32) -> (i32, i32) {
    %c0_i32 = arith.constant 0 : i32
    %c0_i32_0 = arith.constant 0 : i32
    %c0_i32_1 = arith.constant 0 : i32
    return %c0_i32, %c0_i32_0 : i32, i32
  }
  func.func @transform_3(%arg0: i32) -> (i32, i32) {
    %c0_i32 = arith.constant 0 : i32
    %c0_i32_0 = arith.constant 0 : i32
    return %arg0, %c0_i32 : i32, i32
  }
}

module attributes {stable_mosaic.version = 11 : i64} {
  func.func @_gru_kernel(%arg0: i32, %arg1: memref<4x2x32xbf16, #tpu.memory_space<vmem>>, %arg2: memref<32x96xbf16, #tpu.memory_space<vmem>>, %arg3: memref<1x96xf32, #tpu.memory_space<vmem>>, %arg4: memref<32x96xf32, #tpu.memory_space<vmem>>, %arg5: memref<1x96xf32, #tpu.memory_space<vmem>>, %arg6: memref<2x32xf32, #tpu.memory_space<vmem>>) attributes {dimension_semantics = [#tpu.dimension_semantics<arbitrary>], iteration_bounds = array<i64: 1>, scalar_prefetch = 0 : i64, scratch_operands = 0 : i64, tpu.core_type = #tpu.core_type<tc>, window_params = [{pipeline_mode = #tpu.pipeline_mode<synchronous>, transform_indices = @transform_0, window_bounds = array<i64: 4, 2, 32>}, {pipeline_mode = #tpu.pipeline_mode<synchronous>, transform_indices = @transform_1, window_bounds = array<i64: 32, 96>}, {pipeline_mode = #tpu.pipeline_mode<synchronous>, transform_indices = @transform_2, window_bounds = array<i64: 1, 96>}, {pipeline_mode = #tpu.pipeline_mode<synchronous>, transform_indices = @transform_3, window_bounds = array<i64: 32, 96>}, {pipeline_mode = #tpu.pipeline_mode<synchronous>, transform_indices = @transform_4, window_bounds = array<i64: 1, 96>}, {pipeline_mode = #tpu.pipeline_mode<synchronous>, transform_indices = @transform_5, window_bounds = array<i64: 2, 32>}]} {
    %c0 = arith.constant 0 : index
    %c0_0 = arith.constant 0 : index
    %0 = vector.load %arg2[%c0, %c0_0] : memref<32x96xbf16, #tpu.memory_space<vmem>>, vector<32x96xbf16>
    %c0_1 = arith.constant 0 : index
    %c0_2 = arith.constant 0 : index
    %1 = vector.load %arg4[%c0_1, %c0_2] : memref<32x96xf32, #tpu.memory_space<vmem>>, vector<32x96xf32>
    %c0_3 = arith.constant 0 : index
    %c0_4 = arith.constant 0 : index
    %2 = vector.load %arg3[%c0_3, %c0_4] : memref<1x96xf32, #tpu.memory_space<vmem>>, vector<1x96xf32>
    %c0_5 = arith.constant 0 : index
    %c0_6 = arith.constant 0 : index
    %3 = vector.load %arg5[%c0_5, %c0_6] : memref<1x96xf32, #tpu.memory_space<vmem>>, vector<1x96xf32>
    %cst = arith.constant 0.000000e+00 : f32
    %4 = vector.broadcast %cst : f32 to vector<2x32xf32>
    %c0_i32 = arith.constant 0 : i32
    %5 = arith.index_cast %c0_i32 : i32 to index
    %c0_7 = arith.constant 0 : index
    %c0_8 = arith.constant 0 : index
    %6 = vector.load %arg1[%5, %c0_7, %c0_8] : memref<4x2x32xbf16, #tpu.memory_space<vmem>>, vector<1x2x32xbf16>
    %7 = vector.shape_cast %6 : vector<1x2x32xbf16> to vector<2x32xbf16>
    %cst_9 = arith.constant dense<0.000000e+00> : vector<2x96xf32>
    %8 = tpu.matmul %7, %0, %cst_9 {dimension_numbers = #tpu.dot_dimension_numbers<[1], [0], [0], [1], [0, 0, 1, 1], [], []>} : vector<2x32xbf16>, vector<32x96xbf16>, vector<2x96xf32> -> vector<2x96xf32>
    %9 = vector.broadcast %2 : vector<1x96xf32> to vector<2x96xf32>
    %10 = arith.addf %8, %9 : vector<2x96xf32>
    %cst_10 = arith.constant dense<0.000000e+00> : vector<2x96xf32>
    %11 = tpu.matmul %4, %1, %cst_10 {dimension_numbers = #tpu.dot_dimension_numbers<[1], [0], [0], [1], [0, 0, 1, 1], [], []>} : vector<2x32xf32>, vector<32x96xf32>, vector<2x96xf32> -> vector<2x96xf32>
    %12 = vector.broadcast %3 : vector<1x96xf32> to vector<2x96xf32>
    %13 = arith.addf %11, %12 : vector<2x96xf32>
    %14 = vector.extract_strided_slice %10 {offsets = [0, 0], sizes = [2, 32], strides = [1, 1]} : vector<2x96xf32> to vector<2x32xf32>
    %15 = vector.extract_strided_slice %13 {offsets = [0, 0], sizes = [2, 32], strides = [1, 1]} : vector<2x96xf32> to vector<2x32xf32>
    %16 = arith.addf %14, %15 : vector<2x32xf32>
    %17 = arith.negf %16 : vector<2x32xf32>
    %18 = math.exp %17 : vector<2x32xf32>
    %cst_11 = arith.constant 1.000000e+00 : f32
    %19 = vector.broadcast %cst_11 : f32 to vector<2x32xf32>
    %20 = arith.addf %19, %18 : vector<2x32xf32>
    %21 = arith.divf %19, %20 : vector<2x32xf32>
    %22 = vector.extract_strided_slice %10 {offsets = [0, 32], sizes = [2, 32], strides = [1, 1]} : vector<2x96xf32> to vector<2x32xf32>
    %23 = vector.extract_strided_slice %13 {offsets = [0, 32], sizes = [2, 32], strides = [1, 1]} : vector<2x96xf32> to vector<2x32xf32>
    %24 = arith.addf %22, %23 : vector<2x32xf32>
    %25 = arith.negf %24 : vector<2x32xf32>
    %26 = math.exp %25 : vector<2x32xf32>
    %cst_12 = arith.constant 1.000000e+00 : f32
    %27 = vector.broadcast %cst_12 : f32 to vector<2x32xf32>
    %28 = arith.addf %27, %26 : vector<2x32xf32>
    %29 = arith.divf %27, %28 : vector<2x32xf32>
    %30 = vector.extract_strided_slice %10 {offsets = [0, 64], sizes = [2, 32], strides = [1, 1]} : vector<2x96xf32> to vector<2x32xf32>
    %31 = vector.extract_strided_slice %13 {offsets = [0, 64], sizes = [2, 32], strides = [1, 1]} : vector<2x96xf32> to vector<2x32xf32>
    %32 = arith.mulf %21, %31 : vector<2x32xf32>
    %33 = arith.addf %30, %32 : vector<2x32xf32>
    %34 = math.tanh %33 : vector<2x32xf32>
    %cst_13 = arith.constant 1.000000e+00 : f32
    %35 = vector.broadcast %cst_13 : f32 to vector<2x32xf32>
    %36 = arith.subf %35, %29 : vector<2x32xf32>
    %37 = arith.mulf %36, %34 : vector<2x32xf32>
    %38 = arith.mulf %29, %4 : vector<2x32xf32>
    %39 = arith.addf %37, %38 : vector<2x32xf32>
    %c1_i32 = arith.constant 1 : i32
    %40 = arith.index_cast %c1_i32 : i32 to index
    %c0_14 = arith.constant 0 : index
    %c0_15 = arith.constant 0 : index
    %41 = vector.load %arg1[%40, %c0_14, %c0_15] : memref<4x2x32xbf16, #tpu.memory_space<vmem>>, vector<1x2x32xbf16>
    %42 = vector.shape_cast %41 : vector<1x2x32xbf16> to vector<2x32xbf16>
    %cst_16 = arith.constant dense<0.000000e+00> : vector<2x96xf32>
    %43 = tpu.matmul %42, %0, %cst_16 {dimension_numbers = #tpu.dot_dimension_numbers<[1], [0], [0], [1], [0, 0, 1, 1], [], []>} : vector<2x32xbf16>, vector<32x96xbf16>, vector<2x96xf32> -> vector<2x96xf32>
    %44 = vector.broadcast %2 : vector<1x96xf32> to vector<2x96xf32>
    %45 = arith.addf %43, %44 : vector<2x96xf32>
    %cst_17 = arith.constant dense<0.000000e+00> : vector<2x96xf32>
    %46 = tpu.matmul %39, %1, %cst_17 {dimension_numbers = #tpu.dot_dimension_numbers<[1], [0], [0], [1], [0, 0, 1, 1], [], []>} : vector<2x32xf32>, vector<32x96xf32>, vector<2x96xf32> -> vector<2x96xf32>
    %47 = vector.broadcast %3 : vector<1x96xf32> to vector<2x96xf32>
    %48 = arith.addf %46, %47 : vector<2x96xf32>
    %49 = vector.extract_strided_slice %45 {offsets = [0, 0], sizes = [2, 32], strides = [1, 1]} : vector<2x96xf32> to vector<2x32xf32>
    %50 = vector.extract_strided_slice %48 {offsets = [0, 0], sizes = [2, 32], strides = [1, 1]} : vector<2x96xf32> to vector<2x32xf32>
    %51 = arith.addf %49, %50 : vector<2x32xf32>
    %52 = arith.negf %51 : vector<2x32xf32>
    %53 = math.exp %52 : vector<2x32xf32>
    %cst_18 = arith.constant 1.000000e+00 : f32
    %54 = vector.broadcast %cst_18 : f32 to vector<2x32xf32>
    %55 = arith.addf %54, %53 : vector<2x32xf32>
    %56 = arith.divf %54, %55 : vector<2x32xf32>
    %57 = vector.extract_strided_slice %45 {offsets = [0, 32], sizes = [2, 32], strides = [1, 1]} : vector<2x96xf32> to vector<2x32xf32>
    %58 = vector.extract_strided_slice %48 {offsets = [0, 32], sizes = [2, 32], strides = [1, 1]} : vector<2x96xf32> to vector<2x32xf32>
    %59 = arith.addf %57, %58 : vector<2x32xf32>
    %60 = arith.negf %59 : vector<2x32xf32>
    %61 = math.exp %60 : vector<2x32xf32>
    %cst_19 = arith.constant 1.000000e+00 : f32
    %62 = vector.broadcast %cst_19 : f32 to vector<2x32xf32>
    %63 = arith.addf %62, %61 : vector<2x32xf32>
    %64 = arith.divf %62, %63 : vector<2x32xf32>
    %65 = vector.extract_strided_slice %45 {offsets = [0, 64], sizes = [2, 32], strides = [1, 1]} : vector<2x96xf32> to vector<2x32xf32>
    %66 = vector.extract_strided_slice %48 {offsets = [0, 64], sizes = [2, 32], strides = [1, 1]} : vector<2x96xf32> to vector<2x32xf32>
    %67 = arith.mulf %56, %66 : vector<2x32xf32>
    %68 = arith.addf %65, %67 : vector<2x32xf32>
    %69 = math.tanh %68 : vector<2x32xf32>
    %cst_20 = arith.constant 1.000000e+00 : f32
    %70 = vector.broadcast %cst_20 : f32 to vector<2x32xf32>
    %71 = arith.subf %70, %64 : vector<2x32xf32>
    %72 = arith.mulf %71, %69 : vector<2x32xf32>
    %73 = arith.mulf %64, %39 : vector<2x32xf32>
    %74 = arith.addf %72, %73 : vector<2x32xf32>
    %c2_i32 = arith.constant 2 : i32
    %75 = arith.index_cast %c2_i32 : i32 to index
    %c0_21 = arith.constant 0 : index
    %c0_22 = arith.constant 0 : index
    %76 = vector.load %arg1[%75, %c0_21, %c0_22] : memref<4x2x32xbf16, #tpu.memory_space<vmem>>, vector<1x2x32xbf16>
    %77 = vector.shape_cast %76 : vector<1x2x32xbf16> to vector<2x32xbf16>
    %cst_23 = arith.constant dense<0.000000e+00> : vector<2x96xf32>
    %78 = tpu.matmul %77, %0, %cst_23 {dimension_numbers = #tpu.dot_dimension_numbers<[1], [0], [0], [1], [0, 0, 1, 1], [], []>} : vector<2x32xbf16>, vector<32x96xbf16>, vector<2x96xf32> -> vector<2x96xf32>
    %79 = vector.broadcast %2 : vector<1x96xf32> to vector<2x96xf32>
    %80 = arith.addf %78, %79 : vector<2x96xf32>
    %cst_24 = arith.constant dense<0.000000e+00> : vector<2x96xf32>
    %81 = tpu.matmul %74, %1, %cst_24 {dimension_numbers = #tpu.dot_dimension_numbers<[1], [0], [0], [1], [0, 0, 1, 1], [], []>} : vector<2x32xf32>, vector<32x96xf32>, vector<2x96xf32> -> vector<2x96xf32>
    %82 = vector.broadcast %3 : vector<1x96xf32> to vector<2x96xf32>
    %83 = arith.addf %81, %82 : vector<2x96xf32>
    %84 = vector.extract_strided_slice %80 {offsets = [0, 0], sizes = [2, 32], strides = [1, 1]} : vector<2x96xf32> to vector<2x32xf32>
    %85 = vector.extract_strided_slice %83 {offsets = [0, 0], sizes = [2, 32], strides = [1, 1]} : vector<2x96xf32> to vector<2x32xf32>
    %86 = arith.addf %84, %85 : vector<2x32xf32>
    %87 = arith.negf %86 : vector<2x32xf32>
    %88 = math.exp %87 : vector<2x32xf32>
    %cst_25 = arith.constant 1.000000e+00 : f32
    %89 = vector.broadcast %cst_25 : f32 to vector<2x32xf32>
    %90 = arith.addf %89, %88 : vector<2x32xf32>
    %91 = arith.divf %89, %90 : vector<2x32xf32>
    %92 = vector.extract_strided_slice %80 {offsets = [0, 32], sizes = [2, 32], strides = [1, 1]} : vector<2x96xf32> to vector<2x32xf32>
    %93 = vector.extract_strided_slice %83 {offsets = [0, 32], sizes = [2, 32], strides = [1, 1]} : vector<2x96xf32> to vector<2x32xf32>
    %94 = arith.addf %92, %93 : vector<2x32xf32>
    %95 = arith.negf %94 : vector<2x32xf32>
    %96 = math.exp %95 : vector<2x32xf32>
    %cst_26 = arith.constant 1.000000e+00 : f32
    %97 = vector.broadcast %cst_26 : f32 to vector<2x32xf32>
    %98 = arith.addf %97, %96 : vector<2x32xf32>
    %99 = arith.divf %97, %98 : vector<2x32xf32>
    %100 = vector.extract_strided_slice %80 {offsets = [0, 64], sizes = [2, 32], strides = [1, 1]} : vector<2x96xf32> to vector<2x32xf32>
    %101 = vector.extract_strided_slice %83 {offsets = [0, 64], sizes = [2, 32], strides = [1, 1]} : vector<2x96xf32> to vector<2x32xf32>
    %102 = arith.mulf %91, %101 : vector<2x32xf32>
    %103 = arith.addf %100, %102 : vector<2x32xf32>
    %104 = math.tanh %103 : vector<2x32xf32>
    %cst_27 = arith.constant 1.000000e+00 : f32
    %105 = vector.broadcast %cst_27 : f32 to vector<2x32xf32>
    %106 = arith.subf %105, %99 : vector<2x32xf32>
    %107 = arith.mulf %106, %104 : vector<2x32xf32>
    %108 = arith.mulf %99, %74 : vector<2x32xf32>
    %109 = arith.addf %107, %108 : vector<2x32xf32>
    %c3_i32 = arith.constant 3 : i32
    %110 = arith.index_cast %c3_i32 : i32 to index
    %c0_28 = arith.constant 0 : index
    %c0_29 = arith.constant 0 : index
    %111 = vector.load %arg1[%110, %c0_28, %c0_29] : memref<4x2x32xbf16, #tpu.memory_space<vmem>>, vector<1x2x32xbf16>
    %112 = vector.shape_cast %111 : vector<1x2x32xbf16> to vector<2x32xbf16>
    %cst_30 = arith.constant dense<0.000000e+00> : vector<2x96xf32>
    %113 = tpu.matmul %112, %0, %cst_30 {dimension_numbers = #tpu.dot_dimension_numbers<[1], [0], [0], [1], [0, 0, 1, 1], [], []>} : vector<2x32xbf16>, vector<32x96xbf16>, vector<2x96xf32> -> vector<2x96xf32>
    %114 = vector.broadcast %2 : vector<1x96xf32> to vector<2x96xf32>
    %115 = arith.addf %113, %114 : vector<2x96xf32>
    %cst_31 = arith.constant dense<0.000000e+00> : vector<2x96xf32>
    %116 = tpu.matmul %109, %1, %cst_31 {dimension_numbers = #tpu.dot_dimension_numbers<[1], [0], [0], [1], [0, 0, 1, 1], [], []>} : vector<2x32xf32>, vector<32x96xf32>, vector<2x96xf32> -> vector<2x96xf32>
    %117 = vector.broadcast %3 : vector<1x96xf32> to vector<2x96xf32>
    %118 = arith.addf %116, %117 : vector<2x96xf32>
    %119 = vector.extract_strided_slice %115 {offsets = [0, 0], sizes = [2, 32], strides = [1, 1]} : vector<2x96xf32> to vector<2x32xf32>
    %120 = vector.extract_strided_slice %118 {offsets = [0, 0], sizes = [2, 32], strides = [1, 1]} : vector<2x96xf32> to vector<2x32xf32>
    %121 = arith.addf %119, %120 : vector<2x32xf32>
    %122 = arith.negf %121 : vector<2x32xf32>
    %123 = math.exp %122 : vector<2x32xf32>
    %cst_32 = arith.constant 1.000000e+00 : f32
    %124 = vector.broadcast %cst_32 : f32 to vector<2x32xf32>
    %125 = arith.addf %124, %123 : vector<2x32xf32>
    %126 = arith.divf %124, %125 : vector<2x32xf32>
    %127 = vector.extract_strided_slice %115 {offsets = [0, 32], sizes = [2, 32], strides = [1, 1]} : vector<2x96xf32> to vector<2x32xf32>
    %128 = vector.extract_strided_slice %118 {offsets = [0, 32], sizes = [2, 32], strides = [1, 1]} : vector<2x96xf32> to vector<2x32xf32>
    %129 = arith.addf %127, %128 : vector<2x32xf32>
    %130 = arith.negf %129 : vector<2x32xf32>
    %131 = math.exp %130 : vector<2x32xf32>
    %cst_33 = arith.constant 1.000000e+00 : f32
    %132 = vector.broadcast %cst_33 : f32 to vector<2x32xf32>
    %133 = arith.addf %132, %131 : vector<2x32xf32>
    %134 = arith.divf %132, %133 : vector<2x32xf32>
    %135 = vector.extract_strided_slice %115 {offsets = [0, 64], sizes = [2, 32], strides = [1, 1]} : vector<2x96xf32> to vector<2x32xf32>
    %136 = vector.extract_strided_slice %118 {offsets = [0, 64], sizes = [2, 32], strides = [1, 1]} : vector<2x96xf32> to vector<2x32xf32>
    %137 = arith.mulf %126, %136 : vector<2x32xf32>
    %138 = arith.addf %135, %137 : vector<2x32xf32>
    %139 = math.tanh %138 : vector<2x32xf32>
    %cst_34 = arith.constant 1.000000e+00 : f32
    %140 = vector.broadcast %cst_34 : f32 to vector<2x32xf32>
    %141 = arith.subf %140, %134 : vector<2x32xf32>
    %142 = arith.mulf %141, %139 : vector<2x32xf32>
    %143 = arith.mulf %134, %109 : vector<2x32xf32>
    %144 = arith.addf %142, %143 : vector<2x32xf32>
    %c4_i32 = arith.constant 4 : i32
    %c0_35 = arith.constant 0 : index
    %c0_36 = arith.constant 0 : index
    %145 = vector.load %arg6[%c0_35, %c0_36] : memref<2x32xf32, #tpu.memory_space<vmem>>, vector<2x32xf32>
    tpu.vector_store %arg6[%c0_35, %c0_36], %144 {strides = array<i32>} : memref<2x32xf32, #tpu.memory_space<vmem>>, vector<2x32xf32>,
    return
  }
  func.func @transform_0(%arg0: i32) -> (i32, i32, i32) {
    %c0_i32 = arith.constant 0 : i32
    %c0_i32_0 = arith.constant 0 : i32
    %c0_i32_1 = arith.constant 0 : i32
    %c0_i32_2 = arith.constant 0 : i32
    return %c0_i32, %c0_i32_0, %c0_i32_1 : i32, i32, i32
  }
  func.func @transform_1(%arg0: i32) -> (i32, i32) {
    %c0_i32 = arith.constant 0 : i32
    %c0_i32_0 = arith.constant 0 : i32
    %c0_i32_1 = arith.constant 0 : i32
    return %c0_i32, %c0_i32_0 : i32, i32
  }
  func.func @transform_2(%arg0: i32) -> (i32, i32) {
    %c0_i32 = arith.constant 0 : i32
    %c0_i32_0 = arith.constant 0 : i32
    %c0_i32_1 = arith.constant 0 : i32
    return %c0_i32, %c0_i32_0 : i32, i32
  }
  func.func @transform_3(%arg0: i32) -> (i32, i32) {
    %c0_i32 = arith.constant 0 : i32
    %c0_i32_0 = arith.constant 0 : i32
    %c0_i32_1 = arith.constant 0 : i32
    return %c0_i32, %c0_i32_0 : i32, i32
  }
  func.func @transform_4(%arg0: i32) -> (i32, i32) {
    %c0_i32 = arith.constant 0 : i32
    %c0_i32_0 = arith.constant 0 : i32
    %c0_i32_1 = arith.constant 0 : i32
    return %c0_i32, %c0_i32_0 : i32, i32
  }
  func.func @transform_5(%arg0: i32) -> (i32, i32) {
    %c0_i32 = arith.constant 0 : i32
    %c0_i32_0 = arith.constant 0 : i32
    %c0_i32_1 = arith.constant 0 : i32
    return %c0_i32, %c0_i32_0 : i32, i32
  }
}

</mosaic_0001>

<bundles_post_ra>
// kernel: reference_encoder.5
= control target key start
LH: loop header
LB: loop body
LE: loop exit
PB: predicated region body
PF: predicated region fallthrough
CT: control target
= control target key end

     0   :  { %s413_s12 = smov 0   ;;  %s452_s0 = inlined_call_operand.vmem [shape: bf16[64,72], index: 0, kind: input, shape index: {}]   ;;  %s453_s1 = inlined_call_operand.vmem [shape: bf16[72,8], index: 1, kind: input, shape index: {}]   ;;  %s454_s2 = inlined_call_operand.vmem [shape: f32[1,8], index: 2, kind: input, shape index: {}]   ;;  %s455_s3 = inlined_call_operand.vmem [shape: bf16[64,8], index: 3, kind: output, shape index: {}]  }
   0x1 LB: > { %s328_s13 = sadd.s32 4294967295, %s391_s12   ;;  %p332_p0 = scmp.ge.s32.totalorder %s391_s12, 1  ;;  %s391_s12 = sphi %s413_s12, %s13_s12  }
   0x2   : > { %p138_p1 = scmp.lt.s32.totalorder %s391_s12, 3 }
   0x4   : > { %p139_p2 = pnand %p332_p0, %p138_p1 }
   0x5   : > { %s333_s16 = sshll.u32 (!%p139_p2), %s328_s13, 2 }
   0x6   : > { %142 = sbr.rel (%p139_p2) target bundleno = 178 (0xb2), region = 32  ;;  %p163_p3 = scmp.lt.s32.totalorder (!%p139_p2), %s333_s16, 7 }
   0xb   : > { %v187_v0 = vld [vmem:[%s453_s1 + $0x20] sm:$0xf]  ;;  %vm236_vm0 = vcmask 1043456   ;;  %v370_v4 = vld [vmem:[%s453_s1 + $0x18] sm:$0xff]  ;;  %v369_v5 = vld [vmem:[%s453_s1 + $0x10] sm:$0xff]  ;;  %s457_s16 = smov (!%p163_p3, %s333_s16), 7 }
   0xc   : > { %v219_v1 = vunpack.c.l.b16 %v187_v0  ;;  %v368_v6 = vld [vmem:[%s453_s1 + $0x8] sm:$0xff]  ;;  %s334_s23 = sshll.u32 %s457_s16, 2  ;;  %v367_v7 = vld [vmem:[%s453_s1] sm:$0xff]  ;;  %vm229_vm1 = vcmask 588800   ;;  %vm267_vm2 = vcmask 60416  }
   0xd   : > { %s166_s28 = scalar_lea.vmem %s452_s0, %s334_s23  ;;  %v384_v10 = vld [vmem:[%s454_s2] ss:$0 sm:$0xff]  ;;  %s172_s6 = scalar_lea.vmem %s455_s3, %s334_s23 }
   0xe   : > { %v224_v2 = vpack.c.b16 %v219_v1, %v219_v1  ;;  %v365_v8 = vld [vmem:[%s166_s28] sm:$0xff]  ;;  %v366_v9 = vld [vmem:[%s166_s28 + $0x8] sm:$0xff] }
  0x10   : > { %v238_v3 = vsel %vm236_vm0, %v224_v2, 0 }
  0x11   : > { %243 = vmatpush.bf16.msra.mxu0 %v238_v3  ;;  %371 = vmatpush.bf16.msra.mxu1 %v238_v3 }
  0x15   : > { %244 = vmatpush.bf16.msra.mxu0 %v370_v4  ;;  %372 = vmatpush.bf16.msra.mxu1 %v370_v4 }
  0x19   : > { %245 = vmatpush.bf16.msra.mxu0 %v369_v5  ;;  %373 = vmatpush.bf16.msra.mxu1 %v369_v5 }
  0x1d   : > { %246 = vmatpush.bf16.msra.mxu0 %v368_v6  ;;  %374 = vmatpush.bf16.msra.mxu1 %v368_v6 }
  0x21   : > { %247 = vmatpush.bf16.msra.mxu0 %v367_v7  ;;  %375 = vmatpush.bf16.msra.mxu1 %v367_v7 }
  0x24   : > { %361 = vmatmul.msk.bf16.vlgmr.msra.gmra.mxu0 %vm229_vm1, %v365_v8  ;;  %362 = vmatmul.msk.bf16.vlgmr.msra.gmra.mxu1 %vm229_vm1, %v366_v9 }
  0xa1   : > { %v249_v11 = vpop.f32.mrf.mxu0  ;;  %v254_v12 = vpop.f32.mrf.mxu1 }
  0xa2   : > { %v250_v13 = vadd.f32 %v384_v10, %v249_v11  ;;  %v255_v16 = vadd.f32 %v384_v10, %v254_v12 }
  0xa4   : > { %v259_v14 = vmax.f32 %v250_v13, 0.0  ;;  %v261_v21 = vmax.f32 %v255_v16, 0.0 }
  0xa6   : > { %v263_v15 = vpack.c.bf16 %v259_v14, %v259_v14  ;;  %v265_v25 = vpack.c.bf16 %v261_v21, %v261_v21 }
  0xa8   : > { %268 = vst.msk [vmem:[%s172_s6] sm:$0xf] %vm267_vm2, %v263_v15 }
  0xa9   : > { %v251_v17 = vpop.f32.mrf.mxu0  ;;  %v256_v18 = vpop.f32.mrf.mxu1  ;;  %270 = vst.msk [vmem:[%s172_s6 + $0x8] sm:$0xf] %vm267_vm2, %v265_v25 }
  0xaa   : > { %v252_v19 = vadd.f32 %v384_v10, %v251_v17  ;;  %v257_v20 = vadd.f32 %v384_v10, %v256_v18 }
  0xac   : > { %v260_v22 = vmax.f32 %v252_v19, 0.0  ;;  %v262_v23 = vmax.f32 %v257_v20, 0.0 }
  0xae   : > { %v264_v24 = vpack.c.bf16 %v260_v22, %v260_v22  ;;  %v266_v26 = vpack.c.bf16 %v262_v23, %v262_v23 }
  0xb0   : > { %269 = vst.msk [vmem:[%s172_s6 + $0x4] sm:$0xf] %vm267_vm2, %v264_v24 }
  0xb1   : > { %271 = vst.msk [vmem:[%s172_s6 + $0xc] sm:$0xf] %vm267_vm2, %v266_v26 }
  0xb2 PF: > { %s13_s12 = sadd.s32 1, %s391_s12  }
  0xb3   : > { %p10_p4 = scmp.ge.s32.totalorder %s13_s12, 4  }
  0xb5   :  { %12 = sbr.rel (!%p10_p4) target bundleno = 1 (0x1), region = 62 }

// kernel: reference_encoder.4
= control target key start
LH: loop header
LB: loop body
LE: loop exit
PB: predicated region body
PF: predicated region fallthrough
CT: control target
= control target key end

     0   :  { %s534_s12 = smov 0   ;;  %s623_s0 = inlined_call_operand.vmem [shape: bf16[256,9], index: 0, kind: input, shape index: {}]   ;;  %s624_s1 = inlined_call_operand.vmem [shape: bf16[9,8], index: 1, kind: input, shape index: {}]   ;;  %s625_s2 = inlined_call_operand.vmem [shape: f32[1,8], index: 2, kind: input, shape index: {}]   ;;  %s626_s3 = inlined_call_operand.vmem [shape: bf16[256,8], index: 3, kind: output, shape index: {}]  }
   0x1 LB: > { %s428_s13 = sadd.s32 4294967295, %s511_s12   ;;  %p432_p0 = scmp.ge.s32.totalorder %s511_s12, 1  ;;  %s511_s12 = sphi %s534_s12, %s13_s12  }
   0x2   : > { %p138_p1 = scmp.lt.s32.totalorder %s511_s12, 3 }
   0x4   : > { %p139_p2 = pnand %p432_p0, %p138_p1 }
   0x5   : > { %s433_s18 = sshll.u32 (!%p139_p2), %s428_s13, 4 }
   0x6   : > { %142 = sbr.rel (%p139_p2) target bundleno = 185 (0xb9), region = 32  ;;  %p163_p3 = scmp.lt.s32.totalorder (!%p139_p2), %s433_s18, 31 }
   0xb   : > { %v471_v0 = vld [vmem:[%s624_s1] sm:$0xf]  ;;  %v491_v1 = vld [vmem:[%s624_s1] sm:$0x10]  ;;  %vm267_vm0 = vcmask 1043456   ;;  %vm268_vm1 = vcmask 1044480  }
   0xc   : > { %v472_v2 = vor.u32 %v491_v1, %v471_v0  ;;  %v513_v3 = vmov 65535   ;;  %s628_s18 = smov (!%p163_p3, %s433_s18), 31  ;;  %vm242_vm2 = vcmask 72704   ;;  %v565_v15 = vld [vmem:[%s625_s2] ss:$0 sm:$0xff]  ;;  %vm355_vm3 = vcmask 60416  }
   0xd   : > { %v269_v4 = vsel %vm267_vm0, 4294967295, %v513_v3  ;;  %s434_s19 = sshll.u32 %s628_s18, 2 }
   0xe   : > { %v270_v5 = vsel %vm268_vm1, %v269_v4, 0  ;;  %s166_s22 = scalar_lea.vmem %s623_s0, %s434_s19  ;;  %s572_s27 = scalar_lea.vmem %s626_s3, %s434_s19 }
   0xf   : > { %v272_v6 = vand.u32 %v472_v2, %v270_v5  ;;  %v483_v7 = vld [vmem:[%s166_s22] sm:$0xff]  ;;  %v485_v8 = vld [vmem:[%s166_s22 + $0x10] sm:$0xff]  ;;  %v484_v11 = vld [vmem:[%s166_s22 + $0x8] sm:$0xff] }
  0x10   : > { %v487_v9 = vld [vmem:[%s166_s22 + $0x20] sm:$0xff]  ;;  %v489_v10 = vld [vmem:[%s166_s22 + $0x30] sm:$0xff]  ;;  %v486_v12 = vld [vmem:[%s166_s22 + $0x18] sm:$0xff] }
  0x11   : > { %281 = vmatpush.bf16.msra.mxu0 %v272_v6  ;;  %492 = vmatpush.bf16.msra.mxu1 %v272_v6  ;;  %v488_v13 = vld [vmem:[%s166_s22 + $0x28] sm:$0xff]  ;;  %v490_v14 = vld [vmem:[%s166_s22 + $0x38] sm:$0xff] }
  0x12   : > { %493 = vmatpush.bf16.msra.mxu2 %v272_v6  ;;  %494 = vmatpush.bf16.msra.mxu3 %v272_v6 }
  0x14   : > { %473 = vmatmul.msk.bf16.vlgmr.msra.gmra.mxu0 %vm242_vm2, %v483_v7  ;;  %475 = vmatmul.msk.bf16.vlgmr.msra.gmra.mxu1 %vm242_vm2, %v485_v8 }
  0x15   : > { %477 = vmatmul.msk.bf16.vlgmr.msra.gmra.mxu2 %vm242_vm2, %v487_v9  ;;  %479 = vmatmul.msk.bf16.vlgmr.msra.gmra.mxu3 %vm242_vm2, %v489_v10 }
  0x24   : > { %474 = vmatmul.msk.bf16.gmra.mxu0 %vm242_vm2, %v484_v11  ;;  %476 = vmatmul.msk.bf16.gmra.mxu1 %vm242_vm2, %v486_v12 }
  0x25   : > { %478 = vmatmul.msk.bf16.gmra.mxu2 %vm242_vm2, %v488_v13  ;;  %480 = vmatmul.msk.bf16.gmra.mxu3 %vm242_vm2, %v490_v14 }
  0x91   : > { %v283_v16 = vpop.f32.mrf.mxu0  ;;  %v293_v17 = vpop.f32.mrf.mxu1 }
  0x92   : > { %v284_v18 = vadd.f32 %v565_v15, %v283_v16  ;;  %v294_v19 = vadd.f32 %v565_v15, %v293_v17 }
  0x94   : > { %v323_v20 = vmax.f32 %v284_v18, 0.0  ;;  %v327_v21 = vmax.f32 %v294_v19, 0.0 }
  0x96   : > { %v339_v22 = vpack.c.bf16 %v323_v20, %v323_v20  ;;  %v343_v23 = vpack.c.bf16 %v327_v21, %v327_v21 }
  0x98   : > { %356 = vst.msk [vmem:[%s572_s27] sm:$0xf] %vm355_vm3, %v339_v22  ;;  %v303_v24 = vpop.f32.mrf.mxu2  ;;  %v313_v25 = vpop.f32.mrf.mxu3 }
  0x99   : > { %360 = vst.msk [vmem:[%s572_s27 + $0x10] sm:$0xf] %vm355_vm3, %v343_v23  ;;  %v304_v26 = vadd.f32 %v565_v15, %v303_v24  ;;  %v314_v27 = vadd.f32 %v565_v15, %v313_v25  ;;  %v285_v28 = vpop.f32.mrf.mxu0  ;;  %v295_v29 = vpop.f32.mrf.mxu1 }
  0x9a   : > { %v286_v30 = vadd.f32 %v565_v15, %v285_v28  ;;  %v296_v31 = vadd.f32 %v565_v15, %v295_v29 }
  0x9b   : > { %v331_v32 = vmax.f32 %v304_v26, 0.0  ;;  %v335_v33 = vmax.f32 %v314_v27, 0.0 }
  0x9c   : > { %v324_v34 = vmax.f32 %v286_v30, 0.0  ;;  %v328_v35 = vmax.f32 %v296_v31, 0.0 }
  0x9d   : > { %v347_v36 = vpack.c.bf16 %v331_v32, %v331_v32  ;;  %v351_v37 = vpack.c.bf16 %v335_v33, %v335_v33 }
  0x9e   : > { %v340_v38 = vpack.c.bf16 %v324_v34, %v324_v34  ;;  %v344_v39 = vpack.c.bf16 %v328_v35, %v328_v35 }
  0x9f   : > { %364 = vst.msk [vmem:[%s572_s27 + $0x20] sm:$0xf] %vm355_vm3, %v347_v36 }
  0xa0   : > { %368 = vst.msk [vmem:[%s572_s27 + $0x30] sm:$0xf] %vm355_vm3, %v351_v37  ;;  %v305_v40 = vpop.f32.mrf.mxu2  ;;  %v315_v41 = vpop.f32.mrf.mxu3 }
  0xa1   : > { %357 = vst.msk [vmem:[%s572_s27 + $0x4] sm:$0xf] %vm355_vm3, %v340_v38  ;;  %v306_v42 = vadd.f32 %v565_v15, %v305_v40  ;;  %v316_v43 = vadd.f32 %v565_v15, %v315_v41  ;;  %v288_v44 = vpop.f32.mrf.mxu0  ;;  %v298_v45 = vpop.f32.mrf.mxu1 }
  0xa2   : > { %361 = vst.msk [vmem:[%s572_s27 + $0x14] sm:$0xf] %vm355_vm3, %v344_v39  ;;  %v289_v46 = vadd.f32 %v565_v15, %v288_v44  ;;  %v299_v47 = vadd.f32 %v565_v15, %v298_v45 }
  0xa3   : > { %v332_v48 = vmax.f32 %v306_v42, 0.0  ;;  %v336_v49 = vmax.f32 %v316_v43, 0.0 }
  0xa4   : > { %v325_v50 = vmax.f32 %v289_v46, 0.0  ;;  %v329_v51 = vmax.f32 %v299_v47, 0.0 }
  0xa5   : > { %v348_v52 = vpack.c.bf16 %v332_v48, %v332_v48  ;;  %v352_v53 = vpack.c.bf16 %v336_v49, %v336_v49 }
  0xa6   : > { %v341_v54 = vpack.c.bf16 %v325_v50, %v325_v50  ;;  %v345_v55 = vpack.c.bf16 %v329_v51, %v329_v51 }
  0xa7   : > { %365 = vst.msk [vmem:[%s572_s27 + $0x24] sm:$0xf] %vm355_vm3, %v348_v52 }
  0xa8   : > { %369 = vst.msk [vmem:[%s572_s27 + $0x34] sm:$0xf] %vm355_vm3, %v352_v53  ;;  %v308_v56 = vpop.f32.mrf.mxu2  ;;  %v318_v57 = vpop.f32.mrf.mxu3 }
  0xa9   : > { %358 = vst.msk [vmem:[%s572_s27 + $0x8] sm:$0xf] %vm355_vm3, %v341_v54  ;;  %v309_v58 = vadd.f32 %v565_v15, %v308_v56  ;;  %v319_v59 = vadd.f32 %v565_v15, %v318_v57  ;;  %v290_v60 = vpop.f32.mrf.mxu0  ;;  %v300_v61 = vpop.f32.mrf.mxu1 }
  0xaa   : > { %362 = vst.msk [vmem:[%s572_s27 + $0x18] sm:$0xf] %vm355_vm3, %v345_v55  ;;  %v291_v62 = vadd.f32 %v565_v15, %v290_v60  ;;  %v301_v63 = vadd.f32 %v565_v15, %v300_v61 }
  0xab   : > { %v333_v0 = vmax.f32 %v309_v58, 0.0  ;;  %v337_v1 = vmax.f32 %v319_v59, 0.0 }
  0xac   : > { %v326_v2 = vmax.f32 %v291_v62, 0.0  ;;  %v330_v3 = vmax.f32 %v301_v63, 0.0 }
  0xad   : > { %v349_v4 = vpack.c.bf16 %v333_v0, %v333_v0  ;;  %v353_v5 = vpack.c.bf16 %v337_v1, %v337_v1 }
  0xae   : > { %v342_v6 = vpack.c.bf16 %v326_v2, %v326_v2  ;;  %v346_v7 = vpack.c.bf16 %v330_v3, %v330_v3 }
  0xaf   : > { %366 = vst.msk [vmem:[%s572_s27 + $0x28] sm:$0xf] %vm355_vm3, %v349_v4 }
  0xb0   : > { %370 = vst.msk [vmem:[%s572_s27 + $0x38] sm:$0xf] %vm355_vm3, %v353_v5  ;;  %v310_v8 = vpop.f32.mrf.mxu2  ;;  %v320_v9 = vpop.f32.mrf.mxu3 }
  0xb1   : > { %359 = vst.msk [vmem:[%s572_s27 + $0xc] sm:$0xf] %vm355_vm3, %v342_v6  ;;  %v311_v10 = vadd.f32 %v565_v15, %v310_v8  ;;  %v321_v11 = vadd.f32 %v565_v15, %v320_v9 }
  0xb2   : > { %363 = vst.msk [vmem:[%s572_s27 + $0x1c] sm:$0xf] %vm355_vm3, %v346_v7 }
  0xb3   : > { %v334_v12 = vmax.f32 %v311_v10, 0.0  ;;  %v338_v13 = vmax.f32 %v321_v11, 0.0 }
  0xb5   : > { %v350_v14 = vpack.c.bf16 %v334_v12, %v334_v12  ;;  %v354_v16 = vpack.c.bf16 %v338_v13, %v338_v13 }
  0xb7   : > { %367 = vst.msk [vmem:[%s572_s27 + $0x2c] sm:$0xf] %vm355_vm3, %v350_v14 }
  0xb8   : > { %371 = vst.msk [vmem:[%s572_s27 + $0x3c] sm:$0xf] %vm355_vm3, %v354_v16 }
  0xb9 PF: > { %s13_s12 = sadd.s32 1, %s511_s12  }
  0xba   : > { %p10_p4 = scmp.ge.s32.totalorder %s13_s12, 4  }
  0xbc   :  { %12 = sbr.rel (!%p10_p4) target bundleno = 1 (0x1), region = 62 }

// kernel: reference_encoder.6
= control target key start
LH: loop header
LB: loop body
LE: loop exit
PB: predicated region body
PF: predicated region fallthrough
CT: control target
= control target key end

     0   :  { %s353_s12 = smov 0   ;;  %s388_s0 = inlined_call_operand.vmem [shape: bf16[16,72], index: 0, kind: input, shape index: {}]   ;;  %s389_s1 = inlined_call_operand.vmem [shape: bf16[72,16], index: 1, kind: input, shape index: {}]   ;;  %s390_s2 = inlined_call_operand.vmem [shape: f32[1,16], index: 2, kind: input, shape index: {}]   ;;  %s391_s3 = inlined_call_operand.vmem [shape: bf16[16,16], index: 3, kind: output, shape index: {}]  }
   0x1 LB: > { %s286_s13 = sadd.s32 4294967295, %s331_s12   ;;  %p290_p0 = scmp.ge.s32.totalorder %s331_s12, 1  ;;  %s331_s12 = sphi %s353_s12, %s13_s12  }
   0x2   : > { %p136_p1 = scmp.lt.s32.totalorder %s331_s12, 3 }
   0x4   : > { %p137_p2 = pnand %p290_p0, %p136_p1 }
   0x5   : > { %p158_p3 = scmp.lt.s32.totalorder (!%p137_p2), %s286_s13, 1 }
   0x6   : > { %140 = sbr.rel (%p137_p2) target bundleno = 170 (0xaa), region = 32 }
   0xb   : > { %v176_v0 = vld [vmem:[%s389_s1 + $0x20] sm:$0xf]  ;;  %vm212_vm0 = vcmask 1043456   ;;  %v315_v4 = vld [vmem:[%s389_s1 + $0x18] sm:$0xff]  ;;  %v314_v5 = vld [vmem:[%s389_s1 + $0x10] sm:$0xff]  ;;  %s393_s13 = smov (!%p158_p3, %s286_s13), 1 }
   0xc   : > { %v198_v1 = vunpack.c.l.b16 %v176_v0  ;;  %v313_v6 = vld [vmem:[%s389_s1 + $0x8] sm:$0xff]  ;;  %s291_s22 = sshll.u32 %s393_s13, 2  ;;  %v312_v7 = vld [vmem:[%s389_s1] sm:$0xff]  ;;  %vm208_vm1 = vcmask 588800   ;;  %vm231_vm2 = vcmask 125952  }
   0xd   : > { %s161_s27 = scalar_lea.vmem %s388_s0, %s291_s22  ;;  %v324_v9 = vld [vmem:[%s390_s2] ss:$0 sm:$0xff]  ;;  %s165_s5 = scalar_lea.vmem %s391_s3, %s291_s22 }
   0xe   : > { %v203_v2 = vpack.c.b16 %v198_v1, %v198_v1  ;;  %v167_v8 = vld [vmem:[%s161_s27] sm:$0xf] }
  0x10   : > { %v214_v3 = vsel %vm212_vm0, %v203_v2, 0 }
  0x11   : > { %219 = vmatpush.bf16.msra.mxu0 %v214_v3 }
  0x15   : > { %220 = vmatpush.bf16.msra.mxu0 %v315_v4 }
  0x19   : > { %221 = vmatpush.bf16.msra.mxu0 %v314_v5 }
  0x1d   : > { %222 = vmatpush.bf16.msra.mxu0 %v313_v6 }
  0x21   : > { %223 = vmatpush.bf16.msra.mxu0 %v312_v7 }
  0x24   : > { %309 = vmatmul.msk.bf16.vlgmr.msra.gmra.mxu0 %vm208_vm1, %v167_v8 }
  0xa1   : > { %v225_v10 = vpop.f32.mrf.mxu0 }
  0xa2   : > { %v226_v11 = vadd.f32 %v324_v9, %v225_v10 }
  0xa4   : > { %v229_v12 = vmax.f32 %v226_v11, 0.0 }
  0xa6   : > { %v230_v13 = vpack.c.bf16 %v229_v12, %v229_v12 }
  0xa8   : > { %232 = vst.msk [vmem:[%s165_s5] sm:$0xf] %vm231_vm2, %v230_v13 }
  0xa9   : > { %v227_v14 = vpop.f32.mrf.mxu0 }
  0xaa PF: > { %s13_s12 = sadd.s32 1, %s331_s12  }
  0xab   : > { %p10_p4 = scmp.ge.s32.totalorder %s13_s12, 4  }
  0xad   :  { %12 = sbr.rel (!%p10_p4) target bundleno = 1 (0x1), region = 62 }

// kernel: reference_encoder.7
= control target key start
LH: loop header
LB: loop body
LE: loop exit
PB: predicated region body
PF: predicated region fallthrough
CT: control target
= control target key end

     0   :  { %s586_s0 = inlined_call_operand.vmem [shape: bf16[4,2,32], index: 0, kind: input, shape index: {}]   ;;  %s587_s1 = inlined_call_operand.vmem [shape: bf16[32,96], index: 1, kind: input, shape index: {}]   ;;  %s588_s2 = inlined_call_operand.vmem [shape: f32[1,96], index: 2, kind: input, shape index: {}]   ;;  %s589_s3 = inlined_call_operand.vmem [shape: f32[32,96], index: 3, kind: input, shape index: {}]   ;;  %s590_s4 = inlined_call_operand.vmem [shape: f32[1,96], index: 4, kind: input, shape index: {}]   ;;  %s591_s5 = inlined_call_operand.hbm [shape: f32[2,32], index: 5, kind: output, shape index: {}]  }
   0x1   :  { %v29_v0 = vld [vmem:[%s589_s3 + $0x18] sm:$0xff]  ;;  %v421_v1 = vld [vmem:[%s587_s1 + $0x8] sm:$0xff]  ;;  %v28_v2 = vld [vmem:[%s589_s3 + $0x10] sm:$0xff] }
   0x2   :  { %83 = vmatpush.msra.mxu1 %v29_v0  ;;  %165 = vmatpush.msra.mxu3 %v29_v0  ;;  %v27_v3 = vld [vmem:[%s589_s3 + $0x8] sm:$0xff]  ;;  %v420_v4 = vld [vmem:[%s587_s1] sm:$0xff] }
   0x3   :  { %58 = vmatpush.bf16.msra.mxu0 %v421_v1  ;;  %141 = vmatpush.bf16.msra.mxu2 %v421_v1 }
   0x4   :  { %84 = vmatpush.msra.mxu1 %v28_v2  ;;  %166 = vmatpush.msra.mxu3 %v28_v2 }
   0x5   :  { %10 = vsyncpa [#allocation3], 0  ;;  %v26_v5 = vld [vmem:[%s589_s3] sm:$0xff]  ;;  %vm48_vm0 = vcmask 261120   ;;  %v478_v7 = vmov 0.0   ;;  %s479_s7 = smov 64  }
   0x6   :  { %85 = vmatpush.msra.mxu1 %v27_v3  ;;  %167 = vmatpush.msra.mxu3 %v27_v3  ;;  %v32_v6 = vld [vmem:[%s586_s0] sm:$0x1]  ;;  %v408_v39 = vld [vmem:[%s586_s0 + $0x1] sm:$0x1]  ;;  %s389_s18 = sshll.u32 %s591_s5, 4  ;;  %s390_s18 = int_to_ptr.hbm [resolvable:$true] %s389_s18 }
   0x7   :  { %59 = vmatpush.bf16.msra.mxu0 %v420_v4  ;;  %142 = vmatpush.bf16.msra.mxu2 %v420_v4  ;;  %v537_v8 = vld [vmem:[%s590_s4] ss:$0 sm:$0xff] }
   0x8   :  { %86 = vmatpush.msra.mxu1 %v26_v5  ;;  %168 = vmatpush.msra.mxu3 %v26_v5  ;;  %v544_v13 = vld [vmem:[%s588_s2] ss:$0 sm:$0xff]  ;;  %s480_s2 = smov 96  }
   0x9   :  { %87 = vmatmul.f32.vlgmr.msra.gmra.mxu1 %v478_v7 }
   0xa   :  { %247 = vmatpush.msrb.mxu3 %v29_v0  ;;  %406 = vmatmul.msk.bf16.vlgmr.msra.gmra.mxu0 %vm48_vm0, %v32_v6  ;;  %v412_v6 = vld [vmem:[%s586_s0 + $0x2] sm:$0x1] }
   0xb   :  { %223 = vmatpush.bf16.msrb.mxu1 %v421_v1  ;;  %329 = vmatpush.msrb.mxu2 %v29_v0 }
   0xc   :  { %248 = vmatpush.msrb.mxu3 %v28_v2  ;;  %305 = vmatpush.bf16.msrb.mxu0 %v421_v1 }
   0xd   :  { %330 = vmatpush.msrb.mxu2 %v28_v2 }
   0xe   :  { %249 = vmatpush.msrb.mxu3 %v27_v3  ;;  %409 = vmatmul.msk.bf16.vlgmr.msra.gmra.mxu2 %vm48_vm0, %v408_v39  ;;  %v416_v39 = vld [vmem:[%s586_s0 + $0x3] sm:$0x1]  ;;  %s481_s0 = smov [#allocation2]  }
   0xf   :  { %224 = vmatpush.bf16.msrb.mxu1 %v420_v4  ;;  %331 = vmatpush.msrb.mxu2 %v27_v3  ;;  %s387_s15 = sshll.u32 %s481_s0, 4  ;;  %s388_s15 = int_to_ptr.vmem [resolvable:$true] %s387_s15 }
  0x10   :  { %250 = vmatpush.msrb.mxu3 %v26_v5  ;;  %306 = vmatpush.bf16.msrb.mxu0 %v420_v4 }
  0x11   :  { %332 = vmatpush.msrb.mxu2 %v26_v5 }
  0x12   :  { %413 = vmatmul.msk.bf16.vlgmr.msrb.gmra.mxu1 %vm48_vm0, %v412_v6 }
  0x1a   :  { %417 = vmatmul.msk.bf16.vlgmr.msrb.gmra.mxu0 %vm48_vm0, %v416_v39 }
  0x86   :  { %v88_v9 = vpop.f32.mrf.mxu1 }
  0x87   :  { %v89_v10 = vadd.f32 %v537_v8, %v88_v9  ;;  %v61_v11 = vpop.f32.mrf.mxu0 }
  0x88   :  { %v62_v14 = vadd.f32 %v544_v13, %v61_v11 }
  0x89   :  { %112 = vrot.lane.b32.xlu0 %v89_v10, %s479_s7 }
  0x8a   :  { %v91_v15 = vadd.f32 %v89_v10, %v62_v14 }
  0x8c   :  { %v407_v16 = vmul.f32 -1.442695, %v91_v15 }
  0x8e   :  { %428 = vpow2.f32 %v407_v16 }
  0x8f   :  { %v63_v12 = vpop.f32.mrf.mxu0  ;;  %v226_v9 = vpop.f32.mrf.mxu1 }
  0x91   :  { %v144_v41 = vpop.f32.mrf.mxu2 }
  0x92   :  { %v145_v45 = vadd.f32 %v544_v13, %v144_v41 }
  0x94   :  { %v429_v17 = vpop.eup %428 }
  0x95   :  { %v95_v18 = vadd.f32 1.0, %v429_v17 }
  0x97   :  { %430 = vrcp.f32 %v95_v18  ;;  %v107_v24 = vand.u32 2147483648, %v95_v18  ;;  %vm101_vm2 = vweird.f32 %v95_v18  ;;  %v105_v25 = vand.u32 2147483647, %v95_v18  ;;  %v228_v10 = vpop.f32.mrf.mxu1  ;;  %v308_v41 = vpop.f32.mrf.mxu0 }
  0x99   :  { %v108_v27 = vor.u32 1.1754944e-38, %v107_v24  ;;  %vm106_vm4 = vcmp.eq.f32.partialorder %v105_v25, 8.507059e+37  ;;  %v146_v42 = vpop.f32.mrf.mxu2 }
  0x9d   :  { %v431_v19 = vpop.eup %430 }
  0x9e   :  { %v97_v20 = vmul.f32 %v431_v19, %v95_v18  ;;  %vm102_vm1 = vweird.f32 %v431_v19 }
  0x9f   :  { %vm103_vm3 = vmor %vm101_vm2, %vm102_vm1  ;;  %v310_v42 = vpop.f32.mrf.mxu0  ;;  %vm380_vm1 = vcmask 254976  }
  0xa0   :  { %v98_v21 = vsub.f32 1.0, %v97_v20 }
  0xa2   :  { %v99_v22 = vmul.f32 %v431_v19, %v98_v21 }
  0xa4   :  { %v100_v23 = vadd.f32 %v431_v19, %v99_v22 }
  0xa6   :  { %v104_v26 = vsel %vm103_vm3, %v431_v19, %v100_v23 }
  0xa7   :  { %v109_v29 = vsel %vm106_vm4, %v108_v27, %v104_v26 }
  0xa8   :  { %v122_v34 = vsub.f32 1.0, %v109_v29  ;;  %v128_v36 = vmul.f32 0.0, %v109_v29 }
  0xfb   :  { %v113_v28 = vpop.permute.xlu0 %112 }
  0xfc   :  { %v115_v30 = vmul.f32 %v113_v28, %v109_v29 }
  0xfe   :  { %117 = vrot.lane.b32.xlu0 %v115_v30, %s479_s7 }
 0x170   :  { %v118_v31 = vpop.permute.xlu0 %117 }
 0x171   :  { %v120_v32 = vadd.f32 %v118_v31, %v62_v14  ;;  %v227_v14 = vadd.f32 %v544_v13, %v226_v9 }
 0x173   :  { %432 = vtanh.f32 %v120_v32 }
 0x179   :  { %v433_v33 = vpop.eup %432 }
 0x17a   :  { %124 = vrot.lane.b32.xlu1 %v433_v33, %s480_s2 }
 0x1ec   :  { %v125_v35 = vpop.permute.xlu1 %124 }
 0x1ed   :  { %v127_v37 = vmul.f32 %v125_v35, %v122_v34 }
 0x1ef   :  { %v129_v38 = vadd.f32 %v128_v36, %v127_v37 }
 0x1f1   :  { %149 = vrot.lane.b32.xlu1 %v129_v38, %s480_s2 }
 0x263   :  { %v150_v40 = vpop.permute.xlu1 %149 }
 0x264   :  { %410 = vmatmul.msk.f32.vlgmr.msra.gmra.mxu3 %vm48_vm0, %v150_v40 }
 0x2e7   :  { %v170_v43 = vpop.f32.mrf.mxu3 }
 0x2e8   :  { %v171_v44 = vadd.f32 %v537_v8, %v170_v43 }
 0x2ea   :  { %194 = vrot.lane.b32.xlu2 %v171_v44, %s479_s7  ;;  %v173_v46 = vadd.f32 %v171_v44, %v145_v45 }
 0x2ec   :  { %v411_v47 = vmul.f32 -1.442695, %v173_v46 }
 0x2ee   :  { %434 = vpow2.f32 %v411_v47 }
 0x2f4   :  { %v435_v48 = vpop.eup %434 }
 0x2f5   :  { %v177_v49 = vadd.f32 1.0, %v435_v48 }
 0x2f7   :  { %436 = vrcp.f32 %v177_v49  ;;  %v189_v55 = vand.u32 2147483648, %v177_v49  ;;  %vm183_vm6 = vweird.f32 %v177_v49  ;;  %v187_v56 = vand.u32 2147483647, %v177_v49 }
 0x2f9   :  { %v190_v58 = vor.u32 1.1754944e-38, %v189_v55  ;;  %vm188_vm8 = vcmp.eq.f32.partialorder %v187_v56, 8.507059e+37 }
 0x2fd   :  { %v437_v50 = vpop.eup %436 }
 0x2fe   :  { %v179_v51 = vmul.f32 %v437_v50, %v177_v49  ;;  %vm184_vm5 = vweird.f32 %v437_v50 }
 0x2ff   :  { %vm185_vm7 = vmor %vm183_vm6, %vm184_vm5 }
 0x300   :  { %v180_v52 = vsub.f32 1.0, %v179_v51 }
 0x302   :  { %v181_v53 = vmul.f32 %v437_v50, %v180_v52 }
 0x304   :  { %v182_v54 = vadd.f32 %v437_v50, %v181_v53 }
 0x306   :  { %v186_v57 = vsel %vm185_vm7, %v437_v50, %v182_v54 }
 0x307   :  { %v191_v60 = vsel %vm188_vm8, %v190_v58, %v186_v57 }
 0x308   :  { %v204_v1 = vsub.f32 1.0, %v191_v60  ;;  %v210_v3 = vmul.f32 %v191_v60, %v129_v38 }
 0x344   :  { %v195_v59 = vpop.permute.xlu2 %194 }
 0x345   :  { %v197_v61 = vmul.f32 %v195_v59, %v191_v60 }
 0x347   :  { %199 = vrot.lane.b32.xlu2 %v197_v61, %s479_s7 }
 0x3a1   :  { %v200_v62 = vpop.permute.xlu2 %199 }
 0x3a2   :  { %v202_v63 = vadd.f32 %v200_v62, %v145_v45  ;;  %v309_v45 = vadd.f32 %v544_v13, %v308_v41 }
 0x3a4   :  { %438 = vtanh.f32 %v202_v63 }
 0x3aa   :  { %v439_v0 = vpop.eup %438 }
 0x3ab   :  { %206 = vrot.lane.b32.xlu0 %v439_v0, %s480_s2 }
 0x41d   :  { %v207_v2 = vpop.permute.xlu0 %206 }
 0x41e   :  { %v209_v4 = vmul.f32 %v207_v2, %v204_v1 }
 0x420   :  { %v211_v5 = vadd.f32 %v210_v3, %v209_v4 }
 0x422   :  { %231 = vrot.lane.b32.xlu1 %v211_v5, %s480_s2 }
 0x494   :  { %v232_v7 = vpop.permute.xlu1 %231 }
 0x495   :  { %414 = vmatmul.msk.f32.vlgmr.msrb.gmra.mxu3 %vm48_vm0, %v232_v7 }
 0x518   :  { %v252_v11 = vpop.f32.mrf.mxu3 }
 0x519   :  { %v253_v12 = vadd.f32 %v537_v8, %v252_v11 }
 0x51b   :  { %276 = vrot.lane.b32.xlu2 %v253_v12, %s479_s7  ;;  %v255_v15 = vadd.f32 %v253_v12, %v227_v14 }
 0x51d   :  { %v415_v16 = vmul.f32 -1.442695, %v255_v15 }
 0x51f   :  { %440 = vpow2.f32 %v415_v16 }
 0x525   :  { %v441_v17 = vpop.eup %440 }
 0x526   :  { %v259_v18 = vadd.f32 1.0, %v441_v17 }
 0x528   :  { %442 = vrcp.f32 %v259_v18  ;;  %v271_v24 = vand.u32 2147483648, %v259_v18  ;;  %vm265_vm10 = vweird.f32 %v259_v18  ;;  %v269_v25 = vand.u32 2147483647, %v259_v18 }
 0x52a   :  { %v272_v27 = vor.u32 1.1754944e-38, %v271_v24  ;;  %vm270_vm12 = vcmp.eq.f32.partialorder %v269_v25, 8.507059e+37 }
 0x52e   :  { %v443_v19 = vpop.eup %442 }
 0x52f   :  { %v261_v20 = vmul.f32 %v443_v19, %v259_v18  ;;  %vm266_vm9 = vweird.f32 %v443_v19 }
 0x530   :  { %vm267_vm11 = vmor %vm265_vm10, %vm266_vm9 }
 0x531   :  { %v262_v21 = vsub.f32 1.0, %v261_v20 }
 0x533   :  { %v263_v22 = vmul.f32 %v443_v19, %v262_v21 }
 0x535   :  { %v264_v23 = vadd.f32 %v443_v19, %v263_v22 }
 0x537   :  { %v268_v26 = vsel %vm267_vm11, %v443_v19, %v264_v23 }
 0x538   :  { %v273_v29 = vsel %vm270_vm12, %v272_v27, %v268_v26 }
 0x539   :  { %v286_v34 = vsub.f32 1.0, %v273_v29  ;;  %v292_v36 = vmul.f32 %v273_v29, %v211_v5 }
 0x575   :  { %v277_v28 = vpop.permute.xlu2 %276 }
 0x576   :  { %v279_v30 = vmul.f32 %v277_v28, %v273_v29 }
 0x578   :  { %281 = vrot.lane.b32.xlu0 %v279_v30, %s479_s7 }
 0x5ea   :  { %v282_v31 = vpop.permute.xlu0 %281 }
 0x5eb   :  { %v284_v32 = vadd.f32 %v282_v31, %v227_v14 }
 0x5ed   :  { %444 = vtanh.f32 %v284_v32 }
 0x5f3   :  { %v445_v33 = vpop.eup %444 }
 0x5f4   :  { %288 = vrot.lane.b32.xlu1 %v445_v33, %s480_s2 }
 0x666   :  { %v289_v35 = vpop.permute.xlu1 %288 }
 0x667   :  { %v291_v37 = vmul.f32 %v289_v35, %v286_v34 }
 0x669   :  { %v293_v38 = vadd.f32 %v292_v36, %v291_v37 }
 0x66b   :  { %313 = vrot.lane.b32.xlu2 %v293_v38, %s480_s2 }
 0x6c5   :  { %v314_v40 = vpop.permute.xlu2 %313 }
 0x6c6   :  { %418 = vmatmul.msk.f32.vlgmr.msrb.gmra.mxu2 %vm48_vm0, %v314_v40 }
 0x749   :  { %v334_v43 = vpop.f32.mrf.mxu2 }
 0x74a   :  { %v335_v44 = vadd.f32 %v537_v8, %v334_v43 }
 0x74c   :  { %358 = vrot.lane.b32.xlu0 %v335_v44, %s479_s7  ;;  %v337_v46 = vadd.f32 %v335_v44, %v309_v45 }
 0x74e   :  { %v419_v47 = vmul.f32 -1.442695, %v337_v46 }
 0x750   :  { %446 = vpow2.f32 %v419_v47 }
 0x756   :  { %v447_v48 = vpop.eup %446 }
 0x757   :  { %v341_v49 = vadd.f32 1.0, %v447_v48 }
 0x759   :  { %448 = vrcp.f32 %v341_v49  ;;  %v353_v55 = vand.u32 2147483648, %v341_v49  ;;  %vm347_vm14 = vweird.f32 %v341_v49  ;;  %v351_v56 = vand.u32 2147483647, %v341_v49 }
 0x75b   :  { %v354_v57 = vor.u32 1.1754944e-38, %v353_v55  ;;  %vm352_vm0 = vcmp.eq.f32.partialorder %v351_v56, 8.507059e+37 }
 0x75f   :  { %v449_v50 = vpop.eup %448 }
 0x760   :  { %v343_v51 = vmul.f32 %v449_v50, %v341_v49  ;;  %vm348_vm13 = vweird.f32 %v449_v50 }
 0x761   :  { %vm349_vm15 = vmor %vm347_vm14, %vm348_vm13 }
 0x762   :  { %v344_v52 = vsub.f32 1.0, %v343_v51 }
 0x764   :  { %v345_v53 = vmul.f32 %v449_v50, %v344_v52 }
 0x766   :  { %v346_v54 = vadd.f32 %v449_v50, %v345_v53 }
 0x768   :  { %v350_v8 = vsel %vm349_vm15, %v449_v50, %v346_v54 }
 0x769   :  { %v355_v58 = vsel %vm352_vm0, %v354_v57, %v350_v8 }
 0x76a   :  { %v368_v63 = vsub.f32 1.0, %v355_v58  ;;  %v374_v1 = vmul.f32 %v355_v58, %v293_v38 }
 0x7be   :  { %v359_v13 = vpop.permute.xlu0 %358 }
 0x7bf   :  { %v361_v59 = vmul.f32 %v359_v13, %v355_v58 }
 0x7c1   :  { %363 = vrot.lane.b32.xlu1 %v361_v59, %s479_s7 }
 0x833   :  { %v364_v60 = vpop.permute.xlu1 %363 }
 0x834   :  { %v366_v61 = vadd.f32 %v364_v60, %v309_v45 }
 0x836   :  { %450 = vtanh.f32 %v366_v61 }
 0x83c   :  { %v451_v62 = vpop.eup %450 }
 0x83d   :  { %370 = vrot.lane.b32.xlu2 %v451_v62, %s480_s2 }
 0x897   :  { %v371_v0 = vpop.permute.xlu2 %370 }
 0x898   :  { %v373_v2 = vmul.f32 %v371_v0, %v368_v63 }
 0x89a   :  { %v375_v3 = vadd.f32 %v374_v1, %v373_v2 }
 0x89c   :  { %377 = vrot.lane.b32.xlu0 %v375_v3, %s480_s2 }
 0x90e   :  { %v378_v4 = vpop.permute.xlu0 %377 }
 0x90f   :  { %381 = vst.msk [vmem:[#allocation2] sm:$0x3] %vm380_vm1, %v378_v4 }
 0x910   :  { %392 = dma.vmem_to_hbm [thread:$0]  %s388_s15, 32, %s390_s18, [#allocation3]  }
 0x911   :  { %476 = dma.done.wait [#allocation3], 32  }
 0x912   :  { %477 = vsyncadd [#allocation3], 4294967264 }
 0x913   :  { %397 = vsyncpa [#allocation3], 1 }

</bundles_post_ra>
